<compile_context>
chip_gen: v5e
topology: v5e:2x2
jax: 0.10.0
libtpu: 0.0.40
codegen_flags: <defaults>
</compile_context>

<pallas_src>
import jax
import jax.numpy as jnp
from jax.experimental import pallas as pl
from jax.experimental.pallas import tpu as pltpu


def _round_up(a, b):
    return ((a + b - 1) // b) * b


def _chip_vmem_bytes():
    """Physical per-core VMEM (v5e/v6e: 128 MiB, v7x: 64 MiB); conservative fallback."""
    try:
        return int(pltpu.get_tpu_info().vmem_capacity_bytes)
    except Exception:
        return 64 * 1024 * 1024


def mlp_kernel(x_ref, w1_ref, b1_ref, w2_ref, b2_ref, w3_ref, b3_ref, o_ref):
    x = x_ref[...]                       # (bm, in_p) tile of the batch

    # fc1 + ReLU  (MXU matmul, f32 accumulation; bias add + ReLU in f32)
    h1 = jnp.dot(x, w1_ref[...], preferred_element_type=jnp.float32) + b1_ref[...]
    h1 = jnp.maximum(h1, 0.0).astype(x.dtype)   # back to compute dtype for next MXU op

    # fc2 + ReLU
    h2 = jnp.dot(h1, w2_ref[...], preferred_element_type=jnp.float32) + b2_ref[...]
    h2 = jnp.maximum(h2, 0.0).astype(x.dtype)

    # fc3 (no activation)
    out = jnp.dot(h2, w3_ref[...], preferred_element_type=jnp.float32) + b3_ref[...]
    o_ref[...] = out.astype(o_ref.dtype)


def prepare_mlp_params(w1, b1, w2, b2, w3, b3, *, lane_multiple=128, compute_dtype=None):
    """One-time parameter prep (hoisted out of the per-call forward).

    Pads every feature dim to `lane_multiple` (lane-dense MXU operands and unmasked
    output stores; zero-padding is exact for Linear+ReLU) and optionally casts the
    weights to `compute_dtype` (bf16 recommended on v5e/v6e/v7x). Biases stay f32
    so they add directly into the f32 accumulator.

    lane_multiple: 128 is always safe; 256 can better fill v6e/v7x's 2x256^2 MXU
    for mid-size hidden layers (keep 128 on v5e).
    """
    in_dim, h1 = w1.shape
    _, h2 = w2.shape
    _, out_dim = w3.shape

    in_p = _round_up(in_dim, lane_multiple)
    h1_p = _round_up(h1, lane_multiple)
    h2_p = _round_up(h2, lane_multiple)
    out_p = _round_up(out_dim, lane_multiple)

    wdt = compute_dtype if compute_dtype is not None else w1.dtype

    def pad2(a, rows, cols, dt):
        a = a.astype(dt)
        if a.shape == (rows, cols):
            return a
        return jnp.pad(a, ((0, rows - a.shape[0]), (0, cols - a.shape[1])))

    params = dict(
        w1=pad2(w1, in_p, h1_p, wdt),
        b1=pad2(b1.reshape(1, -1), 1, h1_p, jnp.float32),
        w2=pad2(w2, h1_p, h2_p, wdt),
        b2=pad2(b2.reshape(1, -1), 1, h2_p, jnp.float32),
        w3=pad2(w3, h2_p, out_p, wdt),
        b3=pad2(b3.reshape(1, -1), 1, out_p, jnp.float32),
    )
    dims = dict(in_dim=in_dim, h1=h1, h2=h2, out_dim=out_dim,
                in_p=in_p, h1_p=h1_p, h2_p=h2_p, out_p=out_p)
    return params, dims


def simple_mlp_forward_prepared(x, params, dims, *, bm=None):
    """Fused fc1->ReLU->fc2->ReLU->fc3 using pre-padded / pre-cast params."""
    out_dtype = x.dtype
    M, in_dim = x.shape
    assert in_dim == dims["in_dim"]

    in_p, h1_p, h2_p, out_p = dims["in_p"], dims["h1_p"], dims["h2_p"], dims["out_p"]
    out_dim = dims["out_dim"]

    cdt = params["w1"].dtype              # compute (operand) dtype
    if x.dtype != cdt:
        x = x.astype(cdt)

    # ----- batch tile selection ---------------------------------------------
    sub = 16 if cdt == jnp.bfloat16 else 8
    # Cap bm so resident weights + f32 intermediates (+ bf16 recasts) stay in VMEM
    # comfortably even with wide hidden layers.
    bm_cap = 512 if (h1_p + h2_p + out_p) <= 2048 else 256
    if bm is None:
        if M <= sub:
            bm = sub
        else:
            # >= 2 blocks (v7x has 2 TensorCores; also enables x/out pipelining),
            # and pick bm to minimize M padding instead of rounding M up to bm_cap.
            nblk = max(2, pl.cdiv(M, bm_cap))
            bm = max(sub, _round_up(pl.cdiv(M, nblk), sub))
    bm = max(sub, _round_up(bm, sub))
    M_p = _round_up(M, bm)

    # Pad x only when actually needed (skip the extra HBM read/write otherwise).
    if x.shape != (M_p, in_p):
        x = jnp.pad(x, ((0, M_p - M), (0, in_p - in_dim)))

    grid = (M_p // bm,)

    # ----- cost estimate ------------------------------------------------------
    cdt_bytes = jnp.dtype(cdt).itemsize
    out_b = jnp.dtype(out_dtype).itemsize
    flops = 2 * M_p * (in_p * h1_p + h1_p * h2_p + h2_p * out_p)
    bytes_accessed = (
        M_p * in_p * cdt_bytes
        + (in_p * h1_p + h1_p * h2_p + h2_p * out_p) * cdt_bytes
        + (h1_p + h2_p + out_p) * 4
        + M_p * out_p * out_b
    )
    cost = pl.CostEstimate(flops=int(flops), transcendentals=0,
                           bytes_accessed=int(bytes_accessed))

    # ----- VMEM budget (clamped to the real chip capacity) -------------------
    wbytes = (in_p * h1_p + h1_p * h2_p + h2_p * out_p) * cdt_bytes   # Buffered(1): 1x
    bbytes = (h1_p + h2_p + out_p) * 4
    tile_bytes = 2 * bm * in_p * cdt_bytes + 2 * bm * out_p * out_b   # double-buffered x/out
    # f32 intermediates (h1, h2, out accumulators) + compute-dtype recast copies of h1/h2.
    inter_bytes = bm * (h1_p + h2_p + out_p) * 4 + bm * (h1_p + h2_p) * cdt_bytes
    want = 2 * (wbytes + bbytes + tile_bytes + inter_bytes)           # 2x headroom
    chip_vmem = _chip_vmem_bytes()
    vmem_limit = int(min(int(0.85 * chip_vmem), max(32 * 1024 * 1024, want)))

    # TODO(synk): for production hidden sizes where resident weights exceed ~1/3 of
    # chip VMEM, add an N grid axis ("arbitrary") over the widest layer with an f32
    # scratch accumulator (or split into per-layer pallas_calls) instead of relying
    # on the all-resident plan.

    # Constant-index weights/biases: fetched once, resident; single-buffered.
    def wspec(shape):
        return pl.BlockSpec(shape, lambda i: (0, 0), pipeline_mode=pl.Buffered(1))

    out_padded = pl.pallas_call(
        mlp_kernel,
        out_shape=jax.ShapeDtypeStruct((M_p, out_p), out_dtype),
        grid_spec=pltpu.PrefetchScalarGridSpec(
            num_scalar_prefetch=0,
            grid=grid,
            in_specs=[
                # Batch-tiled activations. If profiling shows exposed DMA on long
                # grids, bump this (and out_specs) to pipeline_mode=pl.Buffered(3):
                # the VMEM freed by single-buffering the weights pays for it.
                pl.BlockSpec((bm, in_p), lambda i: (i, 0)),
                wspec((in_p, h1_p)),
                wspec((1, h1_p)),
                wspec((h1_p, h2_p)),
                wspec((1, h2_p)),
                wspec((h2_p, out_p)),
                wspec((1, out_p)),
            ],
            out_specs=pl.BlockSpec((bm, out_p), lambda i: (i, 0)),
        ),
        compiler_params=pltpu.CompilerParams(
            dimension_semantics=("parallel",),
            vmem_limit_bytes=vmem_limit,
        ),
        cost_estimate=cost,
    )(x, params["w1"], params["b1"], params["w2"], params["b2"],
      params["w3"], params["b3"])

    if (M_p, out_p) != (M, out_dim):
        out_padded = out_padded[:M, :out_dim]
    return out_padded


def simple_mlp_forward(x, w1, b1, w2, b2, w3, b3, *, bm=None,
                       compute_dtype=None, lane_multiple=128):
    """Convenience one-shot path: prep params then run the fused kernel.

    For repeated (inference-style) calls, call prepare_mlp_params() once and reuse
    the result with simple_mlp_forward_prepared() so weights aren't re-padded/cast
    from HBM every forward. compute_dtype=jnp.bfloat16 is recommended on v5e, v6e
    and v7x (bf16-native MXU, half the weight/x DMA bytes); accumulation stays f32.
    """
    params, dims = prepare_mlp_params(w1, b1, w2, b2, w3, b3,
                                      lane_multiple=lane_multiple,
                                      compute_dtype=compute_dtype)
    return simple_mlp_forward_prepared(x, params, dims, bm=bm)


if __name__ == "__main__":
    # Small shapes consistent with the module's forward.
    batch = 16
    input_size = 32
    hidden1_size = 64
    hidden2_size = 64
    output_size = 16

    key = jax.random.PRNGKey(0)
    kx, k1, k2, k3, kb1, kb2, kb3 = jax.random.split(key, 7)

    x = jax.random.normal(kx, (batch, input_size), dtype=jnp.float32)

    # Deterministic parameter init (PyTorch Linear-like uniform bounds), stored as (in, out).
    def init_linear(kw, kb, fan_in, fan_out):
        bound = 1.0 / (fan_in ** 0.5)
        w = jax.random.uniform(kw, (fan_in, fan_out), jnp.float32, -bound, bound)
        b = jax.random.uniform(kb, (1, fan_out), jnp.float32, -bound, bound)
        return w, b

    w1, b1 = init_linear(k1, kb1, input_size, hidden1_size)
    w2, b2 = init_linear(k2, kb2, hidden1_size, hidden2_size)
    w3, b3 = init_linear(k3, kb3, hidden2_size, output_size)

    # Pure-JAX reference.
    ref = jnp.maximum(x @ w1 + b1, 0.0)
    ref = jnp.maximum(ref @ w2 + b2, 0.0)
    ref = ref @ w3 + b3

    # f32 operand path: exact check (one-shot convenience wrapper).
    out_f32 = jax.block_until_ready(simple_mlp_forward(x, w1, b1, w2, b2, w3, b3))
    assert out_f32.shape == (batch, output_size)
    assert jnp.allclose(out_f32, ref, atol=1e-5, rtol=1e-5)

    # bf16 operand path via hoisted param prep (recommended on all generations):
    # params are padded/cast ONCE, then reused per forward. Looser tolerance since
    # h1/h2 are downcast to bf16 between layers (accumulation itself stays f32).
    params_bf16, dims = prepare_mlp_params(w1, b1, w2, b2, w3, b3,
                                           compute_dtype=jnp.bfloat16)
    out_bf16 = jax.block_until_ready(
        simple_mlp_forward_prepared(x, params_bf16, dims)
    )
    assert out_bf16.shape == (batch, output_size)
    assert jnp.allclose(out_bf16, ref, atol=1e-1, rtol=1e-1)

    print("KERNEL_OK")
</pallas_src>

<mosaic_0001>
module attributes {stable_mosaic.version = 11 : i64} {
  func.func @mlp_kernel(%arg0: i32, %arg1: memref<8x128xf32, #tpu.memory_space<vmem>>, %arg2: memref<128x128xf32, #tpu.memory_space<vmem>>, %arg3: memref<1x128xf32, #tpu.memory_space<vmem>>, %arg4: memref<128x128xf32, #tpu.memory_space<vmem>>, %arg5: memref<1x128xf32, #tpu.memory_space<vmem>>, %arg6: memref<128x128xf32, #tpu.memory_space<vmem>>, %arg7: memref<1x128xf32, #tpu.memory_space<vmem>>, %arg8: memref<8x128xf32, #tpu.memory_space<vmem>>) attributes {dimension_semantics = [#tpu.dimension_semantics<parallel>], iteration_bounds = array<i64: 2>, scalar_prefetch = 0 : i64, scratch_operands = 0 : i64, tpu.core_type = #tpu.core_type<tc>, window_params = [{transform_indices = @transform_0, window_bounds = array<i64: 8, 128>}, {pipeline_mode = #tpu.pipeline_mode<synchronous>, transform_indices = @transform_1, window_bounds = array<i64: 128, 128>}, {pipeline_mode = #tpu.pipeline_mode<synchronous>, transform_indices = @transform_2, window_bounds = array<i64: 1, 128>}, {pipeline_mode = #tpu.pipeline_mode<synchronous>, transform_indices = @transform_3, window_bounds = array<i64: 128, 128>}, {pipeline_mode = #tpu.pipeline_mode<synchronous>, transform_indices = @transform_4, window_bounds = array<i64: 1, 128>}, {pipeline_mode = #tpu.pipeline_mode<synchronous>, transform_indices = @transform_5, window_bounds = array<i64: 128, 128>}, {pipeline_mode = #tpu.pipeline_mode<synchronous>, transform_indices = @transform_6, window_bounds = array<i64: 1, 128>}, {transform_indices = @transform_7, window_bounds = array<i64: 8, 128>}]} {
    %c0 = arith.constant 0 : index
    %c0_0 = arith.constant 0 : index
    %0 = vector.load %arg1[%c0, %c0_0] : memref<8x128xf32, #tpu.memory_space<vmem>>, vector<8x128xf32>
    %c0_1 = arith.constant 0 : index
    %c0_2 = arith.constant 0 : index
    %1 = vector.load %arg2[%c0_1, %c0_2] : memref<128x128xf32, #tpu.memory_space<vmem>>, vector<128x128xf32>
    %cst = arith.constant dense<0.000000e+00> : vector<8x128xf32>
    %2 = tpu.matmul %0, %1, %cst {dimension_numbers = #tpu.dot_dimension_numbers<[1], [0], [0], [1], [0, 0, 1, 1], [], []>} : vector<8x128xf32>, vector<128x128xf32>, vector<8x128xf32> -> vector<8x128xf32>
    %c0_3 = arith.constant 0 : index
    %c0_4 = arith.constant 0 : index
    %3 = vector.load %arg3[%c0_3, %c0_4] : memref<1x128xf32, #tpu.memory_space<vmem>>, vector<1x128xf32>
    %4 = vector.broadcast %3 : vector<1x128xf32> to vector<8x128xf32>
    %5 = arith.addf %2, %4 : vector<8x128xf32>
    %cst_5 = arith.constant 0.000000e+00 : f32
    %6 = vector.broadcast %cst_5 : f32 to vector<8x128xf32>
    %7 = arith.maximumf %5, %6 : vector<8x128xf32>
    %c0_6 = arith.constant 0 : index
    %c0_7 = arith.constant 0 : index
    %8 = vector.load %arg4[%c0_6, %c0_7] : memref<128x128xf32, #tpu.memory_space<vmem>>, vector<128x128xf32>
    %cst_8 = arith.constant dense<0.000000e+00> : vector<8x128xf32>
    %9 = tpu.matmul %7, %8, %cst_8 {dimension_numbers = #tpu.dot_dimension_numbers<[1], [0], [0], [1], [0, 0, 1, 1], [], []>} : vector<8x128xf32>, vector<128x128xf32>, vector<8x128xf32> -> vector<8x128xf32>
    %c0_9 = arith.constant 0 : index
    %c0_10 = arith.constant 0 : index
    %10 = vector.load %arg5[%c0_9, %c0_10] : memref<1x128xf32, #tpu.memory_space<vmem>>, vector<1x128xf32>
    %11 = vector.broadcast %10 : vector<1x128xf32> to vector<8x128xf32>
    %12 = arith.addf %9, %11 : vector<8x128xf32>
    %cst_11 = arith.constant 0.000000e+00 : f32
    %13 = vector.broadcast %cst_11 : f32 to vector<8x128xf32>
    %14 = arith.maximumf %12, %13 : vector<8x128xf32>
    %c0_12 = arith.constant 0 : index
    %c0_13 = arith.constant 0 : index
    %15 = vector.load %arg6[%c0_12, %c0_13] : memref<128x128xf32, #tpu.memory_space<vmem>>, vector<128x128xf32>
    %cst_14 = arith.constant dense<0.000000e+00> : vector<8x128xf32>
    %16 = tpu.matmul %14, %15, %cst_14 {dimension_numbers = #tpu.dot_dimension_numbers<[1], [0], [0], [1], [0, 0, 1, 1], [], []>} : vector<8x128xf32>, vector<128x128xf32>, vector<8x128xf32> -> vector<8x128xf32>
    %c0_15 = arith.constant 0 : index
    %c0_16 = arith.constant 0 : index
    %17 = vector.load %arg7[%c0_15, %c0_16] : memref<1x128xf32, #tpu.memory_space<vmem>>, vector<1x128xf32>
    %18 = vector.broadcast %17 : vector<1x128xf32> to vector<8x128xf32>
    %19 = arith.addf %16, %18 : vector<8x128xf32>
    %c0_17 = arith.constant 0 : index
    %c0_18 = arith.constant 0 : index
    %20 = vector.load %arg8[%c0_17, %c0_18] : memref<8x128xf32, #tpu.memory_space<vmem>>, vector<8x128xf32>
    tpu.vector_store %arg8[%c0_17, %c0_18], %19 {strides = array<i32>} : memref<8x128xf32, #tpu.memory_space<vmem>>, vector<8x128xf32>,
    return
  }
  func.func @transform_0(%arg0: i32) -> (i32, i32) {
    %c0_i32 = arith.constant 0 : i32
    %c0_i32_0 = arith.constant 0 : i32
    return %arg0, %c0_i32 : i32, i32
  }
  func.func @transform_1(%arg0: i32) -> (i32, i32) {
    %c0_i32 = arith.constant 0 : i32
    %c0_i32_0 = arith.constant 0 : i32
    %c0_i32_1 = arith.constant 0 : i32
    return %c0_i32, %c0_i32_0 : i32, i32
  }
  func.func @transform_2(%arg0: i32) -> (i32, i32) {
    %c0_i32 = arith.constant 0 : i32
    %c0_i32_0 = arith.constant 0 : i32
    %c0_i32_1 = arith.constant 0 : i32
    return %c0_i32, %c0_i32_0 : i32, i32
  }
  func.func @transform_3(%arg0: i32) -> (i32, i32) {
    %c0_i32 = arith.constant 0 : i32
    %c0_i32_0 = arith.constant 0 : i32
    %c0_i32_1 = arith.constant 0 : i32
    return %c0_i32, %c0_i32_0 : i32, i32
  }
  func.func @transform_4(%arg0: i32) -> (i32, i32) {
    %c0_i32 = arith.constant 0 : i32
    %c0_i32_0 = arith.constant 0 : i32
    %c0_i32_1 = arith.constant 0 : i32
    return %c0_i32, %c0_i32_0 : i32, i32
  }
  func.func @transform_5(%arg0: i32) -> (i32, i32) {
    %c0_i32 = arith.constant 0 : i32
    %c0_i32_0 = arith.constant 0 : i32
    %c0_i32_1 = arith.constant 0 : i32
    return %c0_i32, %c0_i32_0 : i32, i32
  }
  func.func @transform_6(%arg0: i32) -> (i32, i32) {
    %c0_i32 = arith.constant 0 : i32
    %c0_i32_0 = arith.constant 0 : i32
    %c0_i32_1 = arith.constant 0 : i32
    return %c0_i32, %c0_i32_0 : i32, i32
  }
  func.func @transform_7(%arg0: i32) -> (i32, i32) {
    %c0_i32 = arith.constant 0 : i32
    %c0_i32_0 = arith.constant 0 : i32
    return %arg0, %c0_i32 : i32, i32
  }
}

</mosaic_0001>

<bundles_post_ra>
// kernel: tpu_custom_call.1
= control target key start
LH: loop header
LB: loop body
LE: loop exit
PB: predicated region body
PF: predicated region fallthrough
CT: control target
= control target key end

     0   :  { %s1098_s0 = inlined_call_operand.hbm [shape: f32[16,128], index: 0, kind: input, shape index: {}]   ;;  %s1099_s1 = inlined_call_operand.hbm [shape: f32[128,128], index: 1, kind: input, shape index: {}]   ;;  %s1100_s2 = inlined_call_operand.vmem [shape: f32[1,128], index: 2, kind: input, shape index: {}]   ;;  %s1101_s3 = inlined_call_operand.hbm [shape: f32[128,128], index: 3, kind: input, shape index: {}]   ;;  %s1102_s4 = inlined_call_operand.vmem [shape: f32[1,128], index: 4, kind: input, shape index: {}]   ;;  %s1103_s5 = inlined_call_operand.hbm [shape: f32[128,128], index: 5, kind: input, shape index: {}]   ;;  %s1104_s6 = inlined_call_operand.vmem [shape: f32[1,128], index: 6, kind: input, shape index: {}]   ;;  %s1105_s7 = inlined_call_operand.hbm [shape: f32[16,128], index: 7, kind: output, shape index: {}]  }
   0x1   :  { %1106 = sst [smem:[#allocation15_spill]] %s1099_s1 }
   0x2   :  { %12 = vsyncpa [#allocation3], 0 }
   0x3   :  { %14 = vsyncpa [#allocation3 + $0x1], 0 }
   0x4   :  { %15 = vsyncpa [#allocation6], 0 }
   0x5   :  { %16 = vsyncpa [#allocation9], 0 }
   0x6   :  { %17 = vsyncpa [#allocation4], 0 }
   0x7   :  { %19 = vsyncpa [#allocation4 + $0x1], 0  ;;  %s926_s24 = smov 0   ;;  %s928_s25 = smov 0  }
   0x8   :  { %s930_s26 = smov 0   ;;  %s932_s27 = smov 0  }
   0x9 LB: > { %s1107_s1 = sld [smem:[#allocation15_spill]]  ;;  %s950_s8 = sadd.s32 4294967295, %s879_s27   ;;  %s879_s27 = sphi %s932_s27, %s1118_s27   ;;  %s875_s26 = sphi %s930_s26, %s1117_s26   ;;  %s871_s25 = sphi %s928_s25, %s1116_s25   ;;  %s867_s24 = sphi %s926_s24, %s1115_s24  }
   0xa   : > { %p586_p0 = scmp.ge.s32.totalorder %s879_s27, 1  ;;  %p46_p1 = scmp.eq.s32.totalorder %s950_s8, 0 }
   0xb   : > { %p208_p2 = scmp.lt.s32.totalorder %s879_s27, 3  ;;  %s881_s10 = smov [#allocation5]  }
   0xc   : > { %s221_s11 = sshll.u32 %s881_s10, 4  ;;  %s236_s14 = sshll.u32 %s1101_s3, 4  ;;  %s222_s11 = int_to_ptr.vmem [resolvable:$true] %s221_s11  ;;  %s237_s14 = int_to_ptr.hbm [resolvable:$true] %s236_s14 }
   0xd   : > { %p955_p3 = pnand %p586_p0, %p208_p2  ;;  %s253_s18 = sshll.u32 %s1103_s5, 4  ;;  %s254_s18 = int_to_ptr.hbm [resolvable:$true] %s253_s18 }
   0xe   : > { %s882_s19 = smov [#allocation7]   ;;  %s883_s21 = smov 128  }
   0xf   : > { %s219_s30 = sshll.u32 %s1107_s1, 4  ;;  %p619_p4 = pneg %p955_p3  ;;  %s220_s30 = int_to_ptr.hbm [resolvable:$true] %s219_s30 }
  0x10   : > { %s238_s20 = sshll.u32 %s882_s19, 4  ;;  %s884_s22 = smov 8   ;;  %s239_s20 = int_to_ptr.vmem [resolvable:$true] %s238_s20 }
  0x11   : > { %p967_p6 = pnand %p619_p4, %p46_p1  ;;  %s885_s23 = smov [#allocation8]  }
  0x12   : > { %s255_s28 = sshll.u32 %s885_s23, 4  ;;  %s585_s29 = sadd.s32 4294967294, %s879_s27   ;;  %s256_s28 = int_to_ptr.vmem [resolvable:$true] %s255_s28 }
  0x13   : > { %622 = dma.hbm_to_vmem [thread:$0]  (!%p967_p6), %s220_s30, 2048, %s222_s11, [#allocation6], %s883_s21, %s883_s21, %s884_s22  }
  0x14   : > { %625 = dma.hbm_to_vmem [thread:$0]  (!%p967_p6), %s237_s14, 2048, %s239_s20, [#allocation6], %s883_s21, %s883_s21, %s884_s22  }
  0x15   : > { %628 = dma.hbm_to_vmem [thread:$0]  (!%p967_p6), %s254_s18, 2048, %s256_s28, [#allocation9], %s883_s21, %s883_s21, %s884_s22  }
  0x16   : > { %s982_s10 = sadd.s32 1, %s879_s27   ;;  %s32_s12 = sadd.s32 1, %s875_s26 }
  0x17   : > { %s29_s30 = ssub.s32 %s879_s27, %s982_s10  ;;  %p39_p7 = scmp.ne.s32.totalorder %s875_s26, %s871_s25 }
  0x18   : > { %p30_p8 = scmp.eq.s32.totalorder %s29_s30, 0  ;;  %p40_p9 = scmp.eq.s32.totalorder %s879_s27, 0 }
  0x19   : > { %p45_p10 = scmp.ne.s32.totalorder %s871_s25, %s867_s24  ;;  %p195_p11 = scmp.eq.s32.totalorder %s950_s8, 1 }
  0x1a   : > { %s994_s11 = scalar_select %p30_p8, %s875_s26, %s32_s12  }
  0x1b   : > { %p998_p12 = por %p46_p1, %p45_p10  ;;  %p1002_p13 = por %p195_p11, %p39_p7 }
  0x1c   : > { %p201_p0 = scmp.eq.s32.totalorder %s585_s29, 1  ;;  %p41_p2 = por %p40_p9, %p39_p7 }
  0x1d   : > { %s272_s15 = sand.u32 1, %s875_s26   ;;  %p640_p6 = scmp.lt.s32.totalorder %s879_s27, 2 }
  0x1e   : > { %p1007_p4 = por %p201_p0, %p45_p10  ;;  %s591_s17 = sshll.u32 %s272_s15, 3 }
  0x1f   : > { %s592_s18 = sshll.u32 %s879_s27, 3  ;;  %s276_s23 = scalar_lea.vmem [#allocation2], %s591_s17 }
  0x20   : > { %s280_s21 = scalar_lea.hbm %s1098_s0, %s592_s18  ;;  %s284_s28 = sshll.u32 %s276_s23, 4  ;;  %s285_s28 = int_to_ptr.vmem [resolvable:$true] %s284_s28 }
  0x21   : > { %s282_s22 = sshll.u32 %s280_s21, 4  ;;  %p1016_p8 = pnand %p640_p6, %p41_p2  ;;  %s283_s22 = int_to_ptr.hbm [resolvable:$true] %s282_s22 }
  0x22   : > { %s273_s12 = scalar_lea.sflag [#allocation3], %s272_s15  ;;  %s775_s30 = sshra.s32 %s283_s22, 4  ;;  %s776_s30 = int_to_ptr.hbm [resolvable:$true] %s775_s30 }
  0x23   : > { %s777_s1 = scalar_lea.hbm %s776_s30, 8  ;;  %p779_p9 = pneg %p1016_p8 }
  0x24   : > { %p778_p7 = scmp.ne.s32.totalorder %s776_s30, %s777_s1  ;;  %s782_s17 = scalar_lea.hbm %s1098_s0, 16 }
  0x25   : > { %p783_p0 = scmp.lt.s32.totalorder %s776_s30, %s1098_s0  ;;  %p784_p2 = scmp.lt.s32.totalorder %s782_s17, %s777_s1 }
  0x26   : > { %p780_p10 = pnand %p779_p9, %p778_p7 }
  0x27   : > { %p785_p6 = por %p784_p2, %p783_p0 }
  0x28   : > { %p781_p11 = pneg %p780_p10 }
  0x2a   : > { %p786_p5 = pnand %p785_p6, %p781_p11 }
  0x2c   : > { %789 = shalt.err (!%p786_p5)
}
  0x2d   : > { %632 = dma.hbm_to_vmem [thread:$0]  (!%p1016_p8), %s283_s22, 128, %s285_s28, %s273_s12  }
  0x2e   : > { %293 = sbr.rel (%p955_p3) target bundleno = 485 (0x1e5), region = 48  ;;  %s1033_s15 = sand.u32 (!%p955_p3), 1, %s871_s25  }
  0x2f   : > { %s594_s23 = sshll.u32 (!%p955_p3), %s1033_s15, 3  ;;  %s296_s18 = scalar_lea.sflag (!%p955_p3), [#allocation3], %s1033_s15 }
  0x30   : > { %s1039_s1 = scalar_lea.vmem (!%p955_p3), [#allocation2], %s594_s23 }
  0x33   : > { %850 = dma.done.wait (%p998_p12), %s296_s18, 128  }
  0x34   : > { %852 = vsyncadd (%p998_p12), %s296_s18, 4294967168 }
  0x35   : > { %854 = dma.done.wait (%p46_p1), [#allocation6], 4096  }
  0x36   : > { %856 = vsyncadd (%p46_p1), [#allocation6], 4294963200 }
  0x37   : > { %858 = dma.done.wait (%p46_p1), [#allocation9], 2048  }
  0x38   : > { %860 = vsyncadd (%p46_p1), [#allocation9], 4294965248  ;;  %v362_v0 = vld [vmem:[#allocation5 + $0x78] sm:$0xff]  ;;  %v361_v1 = vld [vmem:[#allocation5 + $0x70] sm:$0xff]  ;;  %s600_s29 = sshll.u32 %s950_s8, 3  ;;  %s345_s21 = scalar_lea.vmem [#allocation10], %s594_s23 }
  0x39   : > { %367 = vmatpush.msra.mxu0 %v362_v0  ;;  %v360_v2 = vld [vmem:[#allocation5 + $0x68] sm:$0xff]  ;;  %v359_v3 = vld [vmem:[#allocation5 + $0x60] sm:$0xff]  ;;  %v403_v4 = vld [vmem:[#allocation7 + $0x78] sm:$0xff]  ;;  %s481_s19 = scalar_lea.hbm %s1105_s7, %s600_s29  ;;  %s483_s18 = sshll.u32 %s345_s21, 4  ;;  %s484_s18 = int_to_ptr.vmem [resolvable:$true] %s483_s18 }
  0x3a   : > { %v358_v5 = vld [vmem:[#allocation5 + $0x58] sm:$0xff]  ;;  %408 = vmatpush.msra.mxu1 %v403_v4  ;;  %v402_v6 = vld [vmem:[#allocation7 + $0x70] sm:$0xff]  ;;  %v401_v7 = vld [vmem:[#allocation7 + $0x68] sm:$0xff]  ;;  %s471_s9 = scalar_lea.sflag [#allocation4], %s1033_s15  ;;  %s825_s29 = scalar_lea.hbm %s1105_s7, 16 }
  0x3b   : > { %368 = vmatpush.msra.mxu0 %v361_v1  ;;  %v357_v8 = vld [vmem:[#allocation5 + $0x50] sm:$0xff]  ;;  %v400_v9 = vld [vmem:[#allocation7 + $0x60] sm:$0xff]  ;;  %v356_v10 = vld [vmem:[#allocation5 + $0x48] sm:$0xff] }
  0x3c   : > { %409 = vmatpush.msra.mxu1 %v402_v6  ;;  %v399_v11 = vld [vmem:[#allocation7 + $0x58] sm:$0xff]  ;;  %v355_v12 = vld [vmem:[#allocation5 + $0x40] sm:$0xff]  ;;  %v398_v13 = vld [vmem:[#allocation7 + $0x50] sm:$0xff] }
  0x3d   : > { %369 = vmatpush.msra.mxu0 %v360_v2  ;;  %v354_v14 = vld [vmem:[#allocation5 + $0x38] sm:$0xff]  ;;  %v397_v15 = vld [vmem:[#allocation7 + $0x48] sm:$0xff]  ;;  %v353_v16 = vld [vmem:[#allocation5 + $0x30] sm:$0xff] }
  0x3e   : > { %410 = vmatpush.msra.mxu1 %v401_v7  ;;  %v396_v17 = vld [vmem:[#allocation7 + $0x40] sm:$0xff]  ;;  %v352_v18 = vld [vmem:[#allocation5 + $0x28] sm:$0xff]  ;;  %v395_v19 = vld [vmem:[#allocation7 + $0x38] sm:$0xff] }
  0x3f   : > { %370 = vmatpush.msra.mxu0 %v359_v3  ;;  %v351_v20 = vld [vmem:[#allocation5 + $0x20] sm:$0xff]  ;;  %v394_v21 = vld [vmem:[#allocation7 + $0x30] sm:$0xff]  ;;  %v350_v22 = vld [vmem:[#allocation5 + $0x18] sm:$0xff] }
  0x40   : > { %411 = vmatpush.msra.mxu1 %v400_v9  ;;  %v393_v23 = vld [vmem:[#allocation7 + $0x28] sm:$0xff]  ;;  %v349_v24 = vld [vmem:[#allocation5 + $0x10] sm:$0xff]  ;;  %v392_v25 = vld [vmem:[#allocation7 + $0x20] sm:$0xff] }
  0x41   : > { %371 = vmatpush.msra.mxu0 %v358_v5  ;;  %v348_v26 = vld [vmem:[#allocation5 + $0x8] sm:$0xff]  ;;  %v391_v27 = vld [vmem:[#allocation7 + $0x18] sm:$0xff]  ;;  %v347_v28 = vld [vmem:[#allocation5] sm:$0xff] }
  0x42   : > { %412 = vmatpush.msra.mxu1 %v399_v11  ;;  %v346_v29 = vld [vmem:[%s1039_s1] sm:$0xff]  ;;  %v389_v31 = vld [vmem:[#allocation7 + $0x8] sm:$0xff]  ;;  %v388_v32 = vld [vmem:[#allocation7] sm:$0xff]  ;;  %s485_s1 = sshll.u32 %s481_s19, 4  ;;  %s486_s1 = int_to_ptr.hbm [resolvable:$true] %s485_s1 }
  0x43   : > { %372 = vmatpush.msra.mxu0 %v357_v8  ;;  %v390_v30 = vld [vmem:[#allocation7 + $0x10] sm:$0xff]  ;;  %v444_v33 = vld [vmem:[#allocation8 + $0x78] sm:$0xff]  ;;  %v442_v35 = vld [vmem:[#allocation8 + $0x68] sm:$0xff]  ;;  %s819_s8 = sshra.s32 %s486_s1, 4  ;;  %s820_s8 = int_to_ptr.hbm [resolvable:$true] %s819_s8 }
  0x44   : > { %413 = vmatpush.msra.mxu1 %v398_v13  ;;  %v443_v34 = vld [vmem:[#allocation8 + $0x70] sm:$0xff]  ;;  %449 = vmatpush.msra.mxu2 %v444_v33  ;;  %v441_v36 = vld [vmem:[#allocation8 + $0x60] sm:$0xff]  ;;  %v440_v37 = vld [vmem:[#allocation8 + $0x58] sm:$0xff]  ;;  %s821_s13 = scalar_lea.hbm %s820_s8, 8  ;;  %p826_p12 = scmp.lt.s32.totalorder %s820_s8, %s1105_s7 }
  0x45   : > { %373 = vmatpush.msra.mxu0 %v356_v10  ;;  %v439_v38 = vld [vmem:[#allocation8 + $0x50] sm:$0xff]  ;;  %v438_v39 = vld [vmem:[#allocation8 + $0x48] sm:$0xff]  ;;  %v437_v40 = vld [vmem:[#allocation8 + $0x40] sm:$0xff]  ;;  %p822_p1 = scmp.ne.s32.totalorder %s820_s8, %s821_s13  ;;  %p827_p8 = scmp.lt.s32.totalorder %s825_s29, %s821_s13 }
  0x46   : > { %414 = vmatpush.msra.mxu1 %v397_v15  ;;  %450 = vmatpush.msra.mxu2 %v443_v34  ;;  %v436_v41 = vld [vmem:[#allocation8 + $0x38] sm:$0xff]  ;;  %v435_v42 = vld [vmem:[#allocation8 + $0x30] sm:$0xff]  ;;  %v434_v43 = vld [vmem:[#allocation8 + $0x28] sm:$0xff] }
  0x47   : > { %374 = vmatpush.msra.mxu0 %v355_v12  ;;  %v433_v44 = vld [vmem:[#allocation8 + $0x20] sm:$0xff]  ;;  %v432_v45 = vld [vmem:[#allocation8 + $0x18] sm:$0xff]  ;;  %v682_v46 = vld [vmem:[%s1100_s2] ss:$0 sm:$0xff]  ;;  %p823_p3 = pnand %p822_p1, %p1002_p13  ;;  %p828_p7 = por %p827_p8, %p826_p12 }
  0x48   : > { %415 = vmatpush.msra.mxu1 %v396_v17  ;;  %451 = vmatpush.msra.mxu2 %v442_v35  ;;  %v431_v50 = vld [vmem:[#allocation8 + $0x10] sm:$0xff]  ;;  %v430_v51 = vld [vmem:[#allocation8 + $0x8] sm:$0xff]  ;;  %v429_v52 = vld [vmem:[#allocation8] sm:$0xff] }
  0x49   : > { %375 = vmatpush.msra.mxu0 %v354_v14  ;;  %v683_v53 = vld [vmem:[%s1102_s4] ss:$0 sm:$0xff]  ;;  %p824_p5 = pneg %p823_p3 }
  0x4a   : > { %416 = vmatpush.msra.mxu1 %v395_v19  ;;  %452 = vmatpush.msra.mxu2 %v441_v36  ;;  %v684_v57 = vld [vmem:[%s1104_s6] ss:$0 sm:$0xff] }
  0x4b   : > { %376 = vmatpush.msra.mxu0 %v353_v16  ;;  %p829_p9 = pnand %p828_p7, %p824_p5 }
  0x4c   : > { %417 = vmatpush.msra.mxu1 %v394_v21  ;;  %453 = vmatpush.msra.mxu2 %v440_v37 }
  0x4d   : > { %377 = vmatpush.msra.mxu0 %v352_v18 }
  0x4e   : > { %418 = vmatpush.msra.mxu1 %v393_v23  ;;  %454 = vmatpush.msra.mxu2 %v439_v38 }
  0x4f   : > { %378 = vmatpush.msra.mxu0 %v351_v20 }
  0x50   : > { %419 = vmatpush.msra.mxu1 %v392_v25  ;;  %455 = vmatpush.msra.mxu2 %v438_v39 }
  0x51   : > { %379 = vmatpush.msra.mxu0 %v350_v22 }
  0x52   : > { %420 = vmatpush.msra.mxu1 %v391_v27  ;;  %456 = vmatpush.msra.mxu2 %v437_v40 }
  0x53   : > { %380 = vmatpush.msra.mxu0 %v349_v24 }
  0x54   : > { %421 = vmatpush.msra.mxu1 %v390_v30  ;;  %457 = vmatpush.msra.mxu2 %v436_v41 }
  0x55   : > { %381 = vmatpush.msra.mxu0 %v348_v26 }
  0x56   : > { %422 = vmatpush.msra.mxu1 %v389_v31  ;;  %458 = vmatpush.msra.mxu2 %v435_v42 }
  0x57   : > { %382 = vmatpush.msra.mxu0 %v347_v28 }
  0x58   : > { %383 = vmatmul.f32.vlgmr.msra.gmra.mxu0 %v346_v29  ;;  %423 = vmatpush.msra.mxu1 %v388_v32 }
  0x59   : > { %459 = vmatpush.msra.mxu2 %v434_v43 }
  0x5b   : > { %460 = vmatpush.msra.mxu2 %v433_v44 }
  0x5d   : > { %461 = vmatpush.msra.mxu2 %v432_v45 }
  0x5f   : > { %462 = vmatpush.msra.mxu2 %v431_v50 }
  0x61   : > { %463 = vmatpush.msra.mxu2 %v430_v51 }
  0x63   : > { %464 = vmatpush.msra.mxu2 %v429_v52 }
  0xd5   : > { %v384_v47 = vpop.f32.mrf.mxu0 }
  0xd6   : > { %v385_v48 = vadd.f32 %v682_v46, %v384_v47 }
  0xd8   : > { %v387_v49 = vmax.f32 %v385_v48, 0.0 }
  0xda   : > { %424 = vmatmul.f32.vlgmr.msra.gmra.mxu1 %v387_v49 }
 0x157   : > { %v425_v54 = vpop.f32.mrf.mxu1 }
 0x158   : > { %v426_v55 = vadd.f32 %v683_v53, %v425_v54 }
 0x15a   : > { %v428_v56 = vmax.f32 %v426_v55, 0.0 }
 0x15c   : > { %465 = vmatmul.f32.vlgmr.msra.gmra.mxu2 %v428_v56 }
 0x1df   : > { %v466_v58 = vpop.f32.mrf.mxu2 }
 0x1e0   : > { %v467_v59 = vadd.f32 %v684_v57, %v466_v58 }
 0x1e2   : > { %469 = vst [vmem:[%s345_s21] sm:$0xff] %v467_v59 }
 0x1e3   : > { %832 = shalt.err (!%p829_p9)
}
 0x1e4   : > { %617 = dma.vmem_to_hbm [thread:$0]  (%p1002_p13), %s484_s18, 128, %s486_s1, %s471_s9  }
 0x1e5 PF: > { %s497_s15 = sand.u32 1, %s867_s24   ;;  %p1114_p10 = scmp.ge.s32.totalorder %s879_s27, 2 }
 0x1e6   : > { %s498_s30 = scalar_lea.sflag [#allocation4], %s497_s15 }
 0x1e7   : > { %p634_p11 = pnand %p1114_p10, %p1007_p4 }
 0x1e9   : > { %p635_p0 = pneg %p634_p11 }
 0x1eb   : > { %862 = dma.done.wait (%p635_p0), %s498_s30, 128  }
 0x1ec   : > { %864 = vsyncadd (%p635_p0), %s498_s30, 4294967168  ;;  %p22_p2 = scmp.ge.s32.totalorder %s982_s10, 4   ;;  %s1115_s24 = smov %s871_s25 }
 0x1ed   : > { %s1116_s25 = smov %s875_s26  ;;  %s1117_s26 = smov %s994_s11 }
 0x1ee   : > { %s1118_s27 = smov %s982_s10  ;;  %24 = sbr.rel (!%p22_p2) target bundleno = 9 (0x9), region = 105 }
 0x1f3   :  { %504 = vsyncpa [#allocation3], 1 }
 0x1f4   :  { %506 = vsyncpa [#allocation3 + $0x1], 1 }
 0x1f5   :  { %507 = vsyncpa [#allocation6], 1 }
 0x1f6   :  { %508 = vsyncpa [#allocation9], 1 }
 0x1f7   :  { %509 = vsyncpa [#allocation4], 1 }
 0x1f8   :  { %511 = vsyncpa [#allocation4 + $0x1], 1 }

</bundles_post_ra>
